<compile_context>
chip_gen: v7x
topology: tpu7x:2x2x1
jax: 0.10.0
libtpu: 0.0.40
codegen_flags: <defaults>
</compile_context>

<pallas_src>
import functools

import jax
import jax.numpy as jnp
from jax.experimental import pallas as pl
from jax.experimental.pallas import tpu as pltpu

_EPS = 1e-5
_VMEM_LIMIT_BYTES = 32 * 1024 * 1024


def _round_up(v: int, m: int) -> int:
    return ((v + m - 1) // m) * m


# --------------------------------------------------------------------------
# Kernels
# --------------------------------------------------------------------------
def _ln_nchw_kernel(*refs, with_bias: bool, eps: float):
    """4D path. x block is (C, T): C on sublanes, H*W tile on lanes.

    Normalize over C (sublane reduce, XLU), rsqrt on EUP, rest VPU.
    """
    if with_bias:
        x_ref, w_ref, b_ref, o_ref = refs
    else:
        x_ref, w_ref, o_ref = refs
        b_ref = None

    x = x_ref[...].astype(jnp.float32)                      # (C, T)
    inv_c = 1.0 / x.shape[0]
    mu = jnp.sum(x, axis=0, keepdims=True) * inv_c          # (1, T)
    xc = x - mu
    var = jnp.sum(xc * xc, axis=0, keepdims=True) * inv_c   # biased (unbiased=False)
    inv = jax.lax.rsqrt(var + eps)                          # EUP slot
    w = w_ref[...].astype(jnp.float32)                      # (C, 1) -> broadcast over T
    if with_bias:
        y = xc * inv * w + b_ref[...].astype(jnp.float32)
    else:
        y = x * inv * w                                     # BiasFree: numerator is raw x
    o_ref[...] = y.astype(o_ref.dtype)


def _ln_rows_kernel(*refs, with_bias: bool, eps: float):
    """Non-4D path. x block is (TR, C): normalize each row over the lane axis."""
    if with_bias:
        x_ref, w_ref, b_ref, o_ref = refs
    else:
        x_ref, w_ref, o_ref = refs
        b_ref = None

    x = x_ref[...].astype(jnp.float32)                      # (TR, C)
    inv_c = 1.0 / x.shape[-1]
    mu = jnp.sum(x, axis=-1, keepdims=True) * inv_c
    xc = x - mu
    var = jnp.sum(xc * xc, axis=-1, keepdims=True) * inv_c
    inv = jax.lax.rsqrt(var + eps)
    w = w_ref[...].astype(jnp.float32)                      # (1, C)
    if with_bias:
        y = xc * inv * w + b_ref[...].astype(jnp.float32)
    else:
        y = x * inv * w
    o_ref[...] = y.astype(o_ref.dtype)


# --------------------------------------------------------------------------
# Tile selection (explicit VMEM budgeting, >=2 grid steps when possible)
# --------------------------------------------------------------------------
def _pick_hw_tile(hw: int, c: int, batch: int) -> int:
    """Lane-axis (H*W) tile for the NCHW kernel.

    Budget ~2 MiB of f32 activations per block so double-buffered in/out plus
    intermediates stay far below v7x's 64 MiB VMEM and v5e's scoped default.
    Any tile < full extent is a multiple of 128 (lane-dense, unmasked stores);
    the ragged tail block is handled by the cdiv grid.
    """
    max_t = max(128, ((2 * 1024 * 1024) // (4 * max(c, 1))) // 128 * 128)
    if hw <= max_t:
        t = hw  # full-extent block (always legal regardless of divisibility)
        # v7x megacore: prefer >= 2 grid steps overall.
        if batch < 2 and hw > 128:
            t_half = min(hw, _round_up(pl.cdiv(hw, 2), 128))
            if t_half < hw:
                t = t_half
        return t
    return max_t


def _pick_row_tile(rows: int) -> int:
    """Sublane-axis (row) tile for the generic last-dim kernel."""
    cap = 1024
    if rows <= cap:
        if rows > 8:
            t = _round_up(pl.cdiv(rows, 2), 8)   # >= 2 grid steps for v7x
            if t < rows:
                return t
        return rows
    return cap  # multiple of 8; ragged tail handled by cdiv grid


# --------------------------------------------------------------------------
# pallas_call wrappers
# --------------------------------------------------------------------------
def _layernorm_nchw(x3, weight, bias, *, with_bias: bool, eps: float):
    """x3: (B, C, HW) in the model's native NCHW layout; normalize over C."""
    b, c, hw = x3.shape
    t = _pick_hw_tile(hw, c, b)
    grid = (b, pl.cdiv(hw, t))

    in_specs = [
        pl.BlockSpec((None, c, t), lambda bi, ti: (bi, 0, ti)),   # activations
        pl.BlockSpec((c, 1), lambda bi, ti: (0, 0)),              # weight (resident)
    ]
    args = [x3, weight.reshape(c, 1)]
    if with_bias:
        in_specs.append(pl.BlockSpec((c, 1), lambda bi, ti: (0, 0)))
        args.append(bias.reshape(c, 1))

    kern = functools.partial(_ln_nchw_kernel, with_bias=with_bias, eps=eps)
    return pl.pallas_call(
        kern,
        out_shape=jax.ShapeDtypeStruct((b, c, hw), x3.dtype),
        grid_spec=pltpu.PrefetchScalarGridSpec(
            num_scalar_prefetch=0,
            grid=grid,
            in_specs=in_specs,
            out_specs=pl.BlockSpec((None, c, t), lambda bi, ti: (bi, 0, ti)),
        ),
        compiler_params=pltpu.CompilerParams(
            dimension_semantics=("parallel", "parallel"),
            vmem_limit_bytes=_VMEM_LIMIT_BYTES),
    )(*args)


def _layernorm_rows(x2, weight, bias, *, with_bias: bool, eps: float):
    """x2: (rows, C); normalize every row over its last dim."""
    rows, c = x2.shape
    tr = _pick_row_tile(rows)
    grid = (pl.cdiv(rows, tr),)

    in_specs = [
        pl.BlockSpec((tr, c), lambda i: (i, 0)),
        pl.BlockSpec((1, c), lambda i: (0, 0)),
    ]
    args = [x2, weight.reshape(1, c)]
    if with_bias:
        in_specs.append(pl.BlockSpec((1, c), lambda i: (0, 0)))
        args.append(bias.reshape(1, c))

    kern = functools.partial(_ln_rows_kernel, with_bias=with_bias, eps=eps)
    return pl.pallas_call(
        kern,
        out_shape=jax.ShapeDtypeStruct((rows, c), x2.dtype),
        grid_spec=pltpu.PrefetchScalarGridSpec(
            num_scalar_prefetch=0,
            grid=grid,
            in_specs=in_specs,
            out_specs=pl.BlockSpec((tr, c), lambda i: (i, 0)),
        ),
        compiler_params=pltpu.CompilerParams(
            dimension_semantics=("parallel",),
            vmem_limit_bytes=_VMEM_LIMIT_BYTES),
    )(*args)


def layernorm(x, weight, bias=None, *, ln_type: str = "WithBias", eps: float = _EPS):
    """Mirror of LayerNorm.forward (BiasFree_LayerNorm / WithBias_LayerNorm)."""
    with_bias = (ln_type != "BiasFree")
    if with_bias and bias is None:
        raise ValueError("WithBias LayerNorm requires a bias parameter")
    if x.ndim == 4:
        b, c, h, w = x.shape
        x3 = x.reshape(b, c, h * w)                 # pure view: no HBM transpose
        y3 = _layernorm_nchw(x3, weight, bias, with_bias=with_bias, eps=eps)
        return y3.reshape(b, c, h, w)
    c = x.shape[-1]
    lead = x.shape[:-1]
    y2 = _layernorm_rows(x.reshape(-1, c), weight, bias,
                         with_bias=with_bias, eps=eps)
    return y2.reshape(*lead, c)


# --------------------------------------------------------------------------
# Pure-JAX reference (mirrors the PyTorch module) and self-test
# --------------------------------------------------------------------------
def _layernorm_ref(x, weight, bias, ln_type, eps=_EPS):
    if x.ndim == 4:
        b, c, h, w = x.shape
        x3 = jnp.transpose(x, (0, 2, 3, 1)).reshape(b, h * w, c)
    else:
        x3 = x
    mu = jnp.mean(x3, axis=-1, keepdims=True)
    var = jnp.mean((x3 - mu) ** 2, axis=-1, keepdims=True)
    if ln_type == "BiasFree":
        y = x3 / jnp.sqrt(var + eps) * weight
    else:
        y = (x3 - mu) / jnp.sqrt(var + eps) * weight + bias
    if x.ndim == 4:
        y = jnp.transpose(y.reshape(b, h, w, c), (0, 3, 1, 2))
    return y


if __name__ == "__main__":
    key = jax.random.PRNGKey(0)
    k1, k2, k3, k4 = jax.random.split(key, 4)

    # 4D path: (B, C, H, W), LayerNorm over C.  C=48 matches Restormer's base
    # dim and exercises the NCHW-native (H*W on lanes) layout.
    B, C, H, W = 2, 48, 16, 16
    x4 = jax.random.normal(k1, (B, C, H, W), jnp.float32)
    w = 1.0 + 0.1 * jax.random.normal(k2, (C,), jnp.float32)
    b = 0.1 * jax.random.normal(k3, (C,), jnp.float32)

    out_wb = layernorm(x4, w, b, ln_type="WithBias")
    out_bf = layernorm(x4, w, ln_type="BiasFree")

    # Non-4D path (module applies the body directly on the last dim).
    x3 = jax.random.normal(k4, (2, 64, C), jnp.float32)
    out_3d = layernorm(x3, w, b, ln_type="WithBias")

    jax.block_until_ready((out_wb, out_bf, out_3d))

    ref_wb = _layernorm_ref(x4, w, b, "WithBias")
    ref_bf = _layernorm_ref(x4, w, None, "BiasFree")
    ref_3d = _layernorm_ref(x3, w, b, "WithBias")

    assert out_wb.shape == x4.shape and out_bf.shape == x4.shape
    assert out_3d.shape == x3.shape
    assert bool(jnp.allclose(out_wb, ref_wb, atol=1e-5, rtol=1e-5))
    assert bool(jnp.allclose(out_bf, ref_bf, atol=1e-5, rtol=1e-5))
    assert bool(jnp.allclose(out_3d, ref_3d, atol=1e-5, rtol=1e-5))
    print("KERNEL_OK")
</pallas_src>

<mosaic_0001>
module attributes {stable_mosaic.version = 11 : i64} {
  func.func @_ln_nchw_kernel(%arg0: i32, %arg1: i32, %arg2: memref<1x48x256xf32, #tpu.memory_space<vmem>>, %arg3: memref<48x1xf32, #tpu.memory_space<vmem>>, %arg4: memref<48x1xf32, #tpu.memory_space<vmem>>, %arg5: memref<1x48x256xf32, #tpu.memory_space<vmem>>) attributes {dimension_semantics = [#tpu.dimension_semantics<parallel>, #tpu.dimension_semantics<parallel>], iteration_bounds = array<i64: 2, 1>, scalar_prefetch = 0 : i64, scratch_operands = 0 : i64, tpu.core_type = #tpu.core_type<tc>, window_params = [{transform_indices = @transform_0, window_bounds = array<i64: 1, 48, 256>}, {pipeline_mode = #tpu.pipeline_mode<synchronous>, transform_indices = @transform_1, window_bounds = array<i64: 48, 1>}, {pipeline_mode = #tpu.pipeline_mode<synchronous>, transform_indices = @transform_2, window_bounds = array<i64: 48, 1>}, {transform_indices = @transform_3, window_bounds = array<i64: 1, 48, 256>}]} {
    %c0 = arith.constant 0 : index
    %c0_0 = arith.constant 0 : index
    %c0_1 = arith.constant 0 : index
    %0 = vector.load %arg2[%c0, %c0_0, %c0_1] : memref<1x48x256xf32, #tpu.memory_space<vmem>>, vector<1x48x256xf32>
    %1 = vector.shape_cast %0 : vector<1x48x256xf32> to vector<48x256xf32>
    %cst = arith.constant dense<0.000000e+00> : vector<256xf32>
    %2 = vector.multi_reduction <add>, %1, %cst [0] : vector<48x256xf32> to vector<256xf32>
    %3 = vector.shape_cast %2 : vector<256xf32> to vector<1x256xf32>
    %cst_2 = arith.constant 0.020833334 : f32
    %4 = vector.broadcast %cst_2 : f32 to vector<1x256xf32>
    %5 = arith.mulf %3, %4 : vector<1x256xf32>
    %6 = vector.broadcast %5 : vector<1x256xf32> to vector<48x256xf32>
    %7 = arith.subf %1, %6 : vector<48x256xf32>
    %8 = arith.mulf %7, %7 : vector<48x256xf32>
    %cst_3 = arith.constant dense<0.000000e+00> : vector<256xf32>
    %9 = vector.multi_reduction <add>, %8, %cst_3 [0] : vector<48x256xf32> to vector<256xf32>
    %10 = vector.shape_cast %9 : vector<256xf32> to vector<1x256xf32>
    %cst_4 = arith.constant 0.020833334 : f32
    %11 = vector.broadcast %cst_4 : f32 to vector<1x256xf32>
    %12 = arith.mulf %10, %11 : vector<1x256xf32>
    %cst_5 = arith.constant 9.99999974E-6 : f32
    %13 = vector.broadcast %cst_5 : f32 to vector<1x256xf32>
    %14 = arith.addf %12, %13 : vector<1x256xf32>
    %15 = math.rsqrt %14 : vector<1x256xf32>
    %c0_6 = arith.constant 0 : index
    %c0_7 = arith.constant 0 : index
    %16 = vector.load %arg3[%c0_6, %c0_7] : memref<48x1xf32, #tpu.memory_space<vmem>>, vector<48x1xf32>
    %17 = vector.broadcast %15 : vector<1x256xf32> to vector<48x256xf32>
    %18 = arith.mulf %7, %17 : vector<48x256xf32>
    %19 = vector.broadcast %16 : vector<48x1xf32> to vector<48x256xf32>
    %20 = arith.mulf %18, %19 : vector<48x256xf32>
    %c0_8 = arith.constant 0 : index
    %c0_9 = arith.constant 0 : index
    %21 = vector.load %arg4[%c0_8, %c0_9] : memref<48x1xf32, #tpu.memory_space<vmem>>, vector<48x1xf32>
    %22 = vector.broadcast %21 : vector<48x1xf32> to vector<48x256xf32>
    %23 = arith.addf %20, %22 : vector<48x256xf32>
    %c0_10 = arith.constant 0 : index
    %c0_11 = arith.constant 0 : index
    %c0_12 = arith.constant 0 : index
    %24 = vector.load %arg5[%c0_10, %c0_11, %c0_12] : memref<1x48x256xf32, #tpu.memory_space<vmem>>, vector<1x48x256xf32>
    %25 = vector.shape_cast %24 : vector<1x48x256xf32> to vector<48x256xf32>
    %26 = vector.shape_cast %23 : vector<48x256xf32> to vector<1x48x256xf32>
    tpu.vector_store %arg5[%c0_10, %c0_11, %c0_12], %26 {strides = array<i32>} : memref<1x48x256xf32, #tpu.memory_space<vmem>>, vector<1x48x256xf32>,
    return
  }
  func.func @transform_0(%arg0: i32, %arg1: i32) -> (i32, i32, i32) {
    %c0_i32 = arith.constant 0 : i32
    %c0_i32_0 = arith.constant 0 : i32
    return %arg0, %c0_i32, %arg1 : i32, i32, i32
  }
  func.func @transform_1(%arg0: i32, %arg1: i32) -> (i32, i32) {
    %c0_i32 = arith.constant 0 : i32
    %c0_i32_0 = arith.constant 0 : i32
    %c0_i32_1 = arith.constant 0 : i32
    return %c0_i32, %c0_i32_0 : i32, i32
  }
  func.func @transform_2(%arg0: i32, %arg1: i32) -> (i32, i32) {
    %c0_i32 = arith.constant 0 : i32
    %c0_i32_0 = arith.constant 0 : i32
    %c0_i32_1 = arith.constant 0 : i32
    return %c0_i32, %c0_i32_0 : i32, i32
  }
  func.func @transform_3(%arg0: i32, %arg1: i32) -> (i32, i32, i32) {
    %c0_i32 = arith.constant 0 : i32
    %c0_i32_0 = arith.constant 0 : i32
    return %arg0, %c0_i32, %arg1 : i32, i32, i32
  }
}

</mosaic_0001>

<bundles_post_ra>
// kernel: tpu_custom_call.1
= control target key start
LH: loop header
LB: loop body
LE: loop exit
PB: predicated region body
PF: predicated region fallthrough
CT: control target
= control target key end

     0   :  { %8 = vsyncpa [#allocation3], 0  ;;  %s996_s0 = inlined_call_operand.hbm [shape: f32[2,48,256], index: 0, kind: input, shape index: {}]   ;;  %s997_s1 = inlined_call_operand.vmem [shape: f32[48,1], index: 1, kind: input, shape index: {}]   ;;  %s998_s2 = inlined_call_operand.vmem [shape: f32[48,1], index: 2, kind: input, shape index: {}]   ;;  %s999_s3 = inlined_call_operand.hbm [shape: f32[2,48,256], index: 3, kind: output, shape index: {}]  }
   0x1   :  { %10 = vsyncpa [#allocation3 + $0x1], 0 }
   0x2   :  { %11 = vsyncpa [#allocation4], 0 }
   0x3   :  { %13 = vsyncpa [#allocation4 + $0x1], 0  ;;  %s747_s12 = smov 0   ;;  %s749_s13 = smov 0  }
   0x4   :  { %s751_s14 = smov 0   ;;  %s753_s15 = smov 0  }
   0x5   :  { %s755_s16 = smov 0   ;;  %s757_s17 = smov 0  }
   0x6 LB: > { %s520_s18 = sadd.s32 4294967295, %s718_s17   ;;  %s521_s19 = sadd.s32 4294967294, %s718_s17   ;;  %s718_s17 = sphi %s757_s17, %s19_s17   ;;  %s714_s16 = sphi %s755_s16, %s1014_s16   ;;  %s710_s15 = sphi %s753_s15, %s1013_s15   ;;  %s706_s14 = sphi %s751_s14, %s1012_s14   ;;  %s702_s13 = sphi %s749_s13, %s1011_s13   ;;  %s698_s12 = sphi %s747_s12, %s1010_s12  }
   0x7   : > { %s31_s20 = sadd.s32 1, %s714_s16  ;;  %s40_s21 = sadd.s32 1, %s706_s14 }
   0x8   : > { %p33_p0 = scmp.ge.s32.totalorder %s31_s20, 2  ;;  %p47_p1 = scmp.ne.s32.totalorder %s706_s14, %s702_s13 }
   0x9   : > { %p48_p2 = scmp.eq.s32.totalorder %s718_s17, 0  ;;  %p53_p3 = scmp.ne.s32.totalorder %s702_s13, %s698_s12 }
   0xa   : > { %s1016_s20 = smov (%p33_p0, %s31_s20), 0  ;;  %p54_p5 = scmp.eq.s32.totalorder %s520_s18, 0 }
   0xb   : > { %p788_p4 = por %p48_p2, %p47_p1  ;;  %s35_s23 = ssub.s32 %s714_s16, %s1016_s20 }
   0xc   : > { %p121_p6 = scmp.eq.s32.totalorder %s520_s18, 1  ;;  %p38_p7 = scmp.eq.s32.totalorder %s35_s23, 0 }
   0xd   : > { %p794_p8 = por %p54_p5, %p53_p3  ;;  %p127_p10 = scmp.eq.s32.totalorder %s521_s19, 1 }
   0xe   : > { %p798_p9 = por %p121_p6, %p47_p1  ;;  %p545_p13 = scmp.lt.s32.totalorder %s718_s17, 2 }
   0xf   : > { %s803_s26 = scalar_select %p38_p7, %s706_s14, %s40_s21  }
  0x10   : > { %s1003_s25 = scalar_select %p798_p9, 1, 0 }
  0x11   : > { %p805_p11 = por %p127_p10, %p53_p3  ;;  %s153_s28 = sand.u32 1, %s706_s14  }
  0x12   : > { %s529_s29 = smul.u32 96, %s153_s28  ;;  %p815_p0 = pnand %p545_p13, %p788_p4 }
  0x13   : > { %s1004_s27 = scalar_select %p805_p11, 1, 0 }
  0x14   : > { %s530_s30 = smul.u32 1536, %s714_s16  ;;  %s157_s8 = scalar_lea.vmem [#allocation2], %s529_s29 }
  0x15   : > { %s166_s9 = sshll.u32 %s157_s8, 4  ;;  %s827_s10 = scalar_lea.sflag [#allocation3], %s153_s28  ;;  %s824_s9 = int_to_ptr.vmem [resolvable:$true] %s166_s9 }
  0x16   : > { %s822_s7 = scalar_lea.hbm %s996_s0, %s530_s30  ;;  %p608_p3 = pneg %p815_p0 }
  0x17   : > { %s606_s11 = scalar_lea.hbm %s822_s7, 1536  ;;  %s611_s21 = scalar_lea.hbm %s996_s0, 3072 }
  0x18   : > { %p607_p2 = scmp.ne.s32.totalorder %s822_s7, %s606_s11  ;;  %p612_p6 = scmp.lt.u32.totalorder %s822_s7, %s996_s0 }
  0x19   : > { %p613_p7 = scmp.lt.u32.totalorder %s611_s21, %s606_s11  ;;  %p615_p13 = scmp.lt.u32.totalorder %s606_s11, %s822_s7 }
  0x1a   : > { %p609_p4 = pnand %p608_p3, %p607_p2 }
  0x1b   : > { %p614_p10 = por %p613_p7, %p612_p6 }
  0x1c   : > { %p610_p5 = pneg %p609_p4 }
  0x1d   : > { %p616_p12 = por %p615_p13, %p614_p10 }
  0x1f   : > { %p617_p1 = pnand %p616_p12, %p610_p5 }
  0x21   : > { %620 = shalt.err (!%p617_p1)
}
  0x22   : > { %s621_s28 = scalar_lea.vmem %s824_s9, 1536  ;;  %s720_s29 = smov [#allocation2]  }
  0x23   : > { %p622_p2 = scmp.ne.s32.totalorder %s824_s9, %s621_s28  ;;  %s626_s30 = sshll.u32 %s720_s29, 4  ;;  %s627_s30 = int_to_ptr.vmem [resolvable:$false] %s626_s30 }
  0x24   : > { %s628_s5 = scalar_lea.vmem %s627_s30, 3072  ;;  %p629_p9 = scmp.lt.s32.totalorder %s824_s9, %s627_s30 }
  0x25   : > { %p624_p4 = pnand %p622_p2, %p608_p3  ;;  %p630_p6 = scmp.lt.s32.totalorder %s628_s5, %s621_s28 }
  0x27   : > { %p625_p11 = pneg %p624_p4  ;;  %p631_p7 = por %p630_p6, %p629_p9 }
  0x29   : > { %p632_p10 = pnand %p631_p7, %p625_p11 }
  0x2b   : > { %635 = shalt.err (!%p632_p10)
}
  0x2c   : > { %s721_s6 = smov 256   ;;  %s722_s8 = smov 16  }
  0x2d   : > { %540 = dma.hbm_to_vmem [thread:$0]  (!%p815_p0), %s822_s7, 1536, %s824_s9, %s827_s10, %s721_s6, %s721_s6, %s722_s8  }
  0x2e   : > { %p174_p12 = scmp.lt.s32.totalorder %s718_s17, 3  ;;  %p1006_p1 = scmp.ge.s32.totalorder %s718_s17, 1 }
  0x30   : > { %p175_p3 = pnand %p1006_p1, %p174_p12 }
  0x31   : > { %s859_s11 = sand.u32 (!%p175_p3), 1, %s702_s13  }
  0x32   : > { %178 = sbr.rel (%p175_p3) target bundleno = 226 (0xe2), region = 32  ;;  %s181_s19 = scalar_lea.sflag (!%p175_p3), [#allocation3], %s859_s11 }
  0x33   : > { %s531_s18 = smul.u32 (!%p175_p3), 96, %s859_s11 }
  0x35   : > { %s865_s21 = scalar_lea.vmem (!%p175_p3), [#allocation2], %s531_s18 }
  0x39   : > { %689 = dma.done.wait (%p794_p8), %s181_s19, 1536  }
  0x3a   : > { %691 = vsyncadd (%p794_p8), %s181_s19, 4294965760  ;;  %v723_v0 = vmov 0   ;;  %v299_v1 = vld [vmem:[%s997_s1 + $0x10] sm:$0xff]  ;;  %v297_v2 = vld [vmem:[%s997_s1] sm:$0xff]  ;;  %s532_s5 = smul.u32 1536, %s710_s15  ;;  %s418_s19 = scalar_lea.sflag [#allocation4], %s859_s11 }
  0x3b   : > { %601 = vset.pattern.permute.xlu1 %v723_v0  ;;  %600 = vset.pattern.permute.xlu0 %v723_v0  ;;  %v300_v3 = vld [vmem:[%s997_s1 + $0x18] sm:$0xff]  ;;  %v298_v4 = vld [vmem:[%s997_s1 + $0x8] sm:$0xff]  ;;  %v301_v6 = vld [vmem:[%s997_s1 + $0x20] sm:$0xff]  ;;  %p1007_p9 = scmp.ne.s32.totalorder %s1003_s25, 0  ;;  %s724_s7 = smov [#allocation5]  }
  0x3c   : > { %327 = vperm.xlu1 %601, %v299_v1   ;;  %317 = vperm.xlu0 %600, %v297_v2   ;;  %v302_v5 = vld [vmem:[%s997_s1 + $0x28] sm:$0xff]  ;;  %v357_v8 = vld [vmem:[%s998_s2] sm:$0xff]  ;;  %v211_v10 = vld [vmem:[%s865_s21 + $0x10] sm:$0xff]  ;;  %s941_s8 = scalar_lea.hbm %s999_s3, %s532_s5  ;;  %s640_s9 = sshll.u32 %s724_s7, 4  ;;  %s641_s9 = int_to_ptr.vmem [resolvable:$false] %s640_s9 }
  0x3d   : > { %v358_v7 = vld [vmem:[%s998_s2 + $0x8] sm:$0xff]  ;;  %v209_v9 = vld [vmem:[%s865_s21] sm:$0xff]  ;;  %v212_v12 = vld [vmem:[%s865_s21 + $0x18] sm:$0xff]  ;;  %s642_s10 = scalar_lea.vmem %s641_s9, 3072 }
  0x3e   : > { %v210_v11 = vld [vmem:[%s865_s21 + $0x8] sm:$0xff]  ;;  %v221_v13 = vadd.f32 %v211_v10, %v209_v9  ;;  %v360_v14 = vld [vmem:[%s998_s2 + $0x18] sm:$0xff]  ;;  %v359_v15 = vld [vmem:[%s998_s2 + $0x10] sm:$0xff] }
  0x3f   : > { %v213_v16 = vld [vmem:[%s865_s21 + $0x20] sm:$0xff]  ;;  %v232_v17 = vadd.f32 %v212_v12, %v210_v11  ;;  %v214_v18 = vld [vmem:[%s865_s21 + $0x28] sm:$0xff]  ;;  %v215_v22 = vld [vmem:[%s865_s21 + $0x30] sm:$0xff] }
  0x40   : > { %332 = vperm.xlu1 %601, %v300_v3   ;;  %322 = vperm.xlu0 %600, %v298_v4   ;;  %v222_v19 = vadd.f32 %v221_v13, %v213_v16  ;;  %v362_v20 = vld [vmem:[%s998_s2 + $0x28] sm:$0xff]  ;;  %v361_v21 = vld [vmem:[%s998_s2 + $0x20] sm:$0xff]  ;;  %v216_v24 = vld [vmem:[%s865_s21 + $0x38] sm:$0xff] }
  0x41   : > { %v233_v23 = vadd.f32 %v232_v17, %v214_v18  ;;  %v217_v26 = vld [vmem:[%s865_s21 + $0x40] sm:$0xff]  ;;  %v218_v28 = vld [vmem:[%s865_s21 + $0x48] sm:$0xff]  ;;  %v219_v30 = vld [vmem:[%s865_s21 + $0x50] sm:$0xff] }
  0x42   : > { %v223_v25 = vadd.f32 %v222_v19, %v215_v22  ;;  %v220_v32 = vld [vmem:[%s865_s21 + $0x58] sm:$0xff]  ;;  %s926_s21 = scalar_lea.vmem [#allocation5], %s531_s18 }
  0x43   : > { %v234_v27 = vadd.f32 %v233_v23, %v216_v24  ;;  %s433_s18 = sshll.u32 %s926_s21, 4  ;;  %s943_s18 = int_to_ptr.vmem [resolvable:$true] %s433_s18 }
  0x44   : > { %342 = vperm.xlu1 %601, %v302_v5   ;;  %337 = vperm.xlu0 %600, %v301_v6   ;;  %v224_v29 = vadd.f32 %v223_v25, %v217_v26  ;;  %s636_s4 = scalar_lea.vmem %s943_s18, 1536  ;;  %p643_p5 = scmp.lt.s32.totalorder %s943_s18, %s641_s9 }
  0x45   : > { %v235_v31 = vadd.f32 %v234_v27, %v218_v28  ;;  %p637_p8 = scmp.ne.s32.totalorder %s943_s18, %s636_s4  ;;  %p644_p13 = scmp.lt.s32.totalorder %s642_s10, %s636_s4 }
  0x46   : > { %v225_v33 = vadd.f32 %v224_v29, %v219_v30 }
  0x47   : > { %v236_v34 = vadd.f32 %v235_v31, %v220_v32  ;;  %p638_p11 = pnand %p637_p8, %p1007_p9  ;;  %p645_p2 = por %p644_p13, %p643_p5 }
  0x48   : > { %370 = vperm.xlu1 %601, %v358_v7   ;;  %365 = vperm.xlu0 %600, %v357_v8   ;;  %v226_v35 = vrot.slane %v225_v33, 4 }
  0x49   : > { %v237_v36 = vrot.slane %v236_v34, 4  ;;  %p639_p0 = pneg %p638_p11 }
  0x4a   : > { %v227_v37 = vadd.f32 %v226_v35, %v225_v33 }
  0x4b   : > { %v238_v38 = vadd.f32 %v237_v36, %v236_v34  ;;  %p646_p4 = pnand %p645_p2, %p639_p0 }
  0x4c   : > { %380 = vperm.xlu1 %601, %v360_v14   ;;  %375 = vperm.xlu0 %600, %v359_v15   ;;  %v228_v39 = vrot.slane %v227_v37, 2 }
  0x4d   : > { %v239_v40 = vrot.slane %v238_v38, 2 }
  0x4e   : > { %v229_v41 = vadd.f32 %v228_v39, %v227_v37 }
  0x4f   : > { %v240_v42 = vadd.f32 %v239_v40, %v238_v38 }
  0x50   : > { %390 = vperm.xlu1 %601, %v362_v20   ;;  %385 = vperm.xlu0 %600, %v361_v21   ;;  %v230_v43 = vrot.slane %v229_v41, 1 }
  0x51   : > { %v241_v44 = vrot.slane %v240_v42, 1 }
  0x52   : > { %v231_v45 = vadd.f32 %v230_v43, %v229_v41 }
  0x53   : > { %v242_v46 = vadd.f32 %v241_v44, %v240_v42 }
  0x54   : > { %v243_v47 = vmul.f32 0.020833334, %v231_v45 }
  0x55   : > { %v244_v48 = vmul.f32 0.020833334, %v242_v46 }
  0x56   : > { %v245_v49 = vsub.f32 %v209_v9, %v243_v47  ;;  %v247_v50 = vsub.f32 %v211_v10, %v243_v47  ;;  %v249_v53 = vsub.f32 %v213_v16, %v243_v47  ;;  %v251_v59 = vsub.f32 %v215_v22, %v243_v47 }
  0x57   : > { %v246_v51 = vsub.f32 %v210_v11, %v244_v48  ;;  %v248_v52 = vsub.f32 %v212_v12, %v244_v48  ;;  %v250_v56 = vsub.f32 %v214_v18, %v244_v48  ;;  %v252_v62 = vsub.f32 %v216_v24, %v244_v48 }
  0x58   : > { %v257_v54 = vmul.f32 %v245_v49, %v245_v49  ;;  %v259_v55 = vmul.f32 %v247_v50, %v247_v50  ;;  %v261_v60 = vmul.f32 %v249_v53, %v249_v53  ;;  %v919_v1 = vsub.f32 %v217_v26, %v243_v47 }
  0x59   : > { %v258_v57 = vmul.f32 %v246_v51, %v246_v51  ;;  %v260_v58 = vmul.f32 %v248_v52, %v248_v52  ;;  %v262_v63 = vmul.f32 %v250_v56, %v250_v56  ;;  %v263_v2 = vmul.f32 %v251_v59, %v251_v59 }
  0x5a   : > { %v269_v61 = vadd.f32 %v259_v55, %v257_v54  ;;  %v254_v4 = vsub.f32 %v218_v28, %v244_v48  ;;  %v264_v5 = vmul.f32 %v252_v62, %v252_v62  ;;  %v255_v7 = vsub.f32 %v219_v30, %v243_v47 }
  0x5b   : > { %v280_v0 = vadd.f32 %v260_v58, %v258_v57  ;;  %v265_v8 = vmul.f32 %v919_v1, %v919_v1  ;;  %v256_v10 = vsub.f32 %v220_v32, %v244_v48 }
  0x5c   : > { %v270_v3 = vadd.f32 %v269_v61, %v261_v60  ;;  %v266_v11 = vmul.f32 %v254_v4, %v254_v4  ;;  %v267_v13 = vmul.f32 %v255_v7, %v255_v7 }
  0x5d   : > { %v281_v6 = vadd.f32 %v280_v0, %v262_v63  ;;  %v268_v15 = vmul.f32 %v256_v10, %v256_v10 }
  0x5e   : > { %v271_v9 = vadd.f32 %v270_v3, %v263_v2 }
  0x5f   : > { %v282_v12 = vadd.f32 %v281_v6, %v264_v5 }
  0x60   : > { %v272_v14 = vadd.f32 %v271_v9, %v265_v8 }
  0x61   : > { %v283_v16 = vadd.f32 %v282_v12, %v266_v11 }
  0x62   : > { %v273_v17 = vadd.f32 %v272_v14, %v267_v13 }
  0x63   : > { %v284_v18 = vadd.f32 %v283_v16, %v268_v15 }
  0x64   : > { %v274_v19 = vrot.slane %v273_v17, 4 }
  0x65   : > { %v285_v20 = vrot.slane %v284_v18, 4 }
  0x66   : > { %v275_v21 = vadd.f32 %v274_v19, %v273_v17 }
  0x67   : > { %v286_v22 = vadd.f32 %v285_v20, %v284_v18 }
  0x68   : > { %v276_v23 = vrot.slane %v275_v21, 2 }
  0x69   : > { %v287_v24 = vrot.slane %v286_v22, 2 }
  0x6a   : > { %v277_v25 = vadd.f32 %v276_v23, %v275_v21 }
  0x6b   : > { %v288_v26 = vadd.f32 %v287_v24, %v286_v22 }
  0x6c   : > { %v278_v27 = vrot.slane %v277_v25, 1 }
  0x6d   : > { %v289_v28 = vrot.slane %v288_v26, 1 }
  0x6e   : > { %v279_v29 = vadd.f32 %v278_v27, %v277_v25 }
  0x6f   : > { %v290_v30 = vadd.f32 %v289_v28, %v288_v26 }
  0x70   : > { %v291_v31 = vmul.f32 0.020833334, %v279_v29 }
  0x71   : > { %v292_v32 = vmul.f32 0.020833334, %v290_v30 }
  0x72   : > { %v293_v33 = vadd.f32 1e-05, %v291_v31 }
  0x73   : > { %v294_v34 = vadd.f32 1e-05, %v292_v32 }
  0x74   : > { %602 = vrsqrt.f32 %v293_v33 }
  0x75   : > { %604 = vrsqrt.f32 %v294_v34 }
  0x7e   : > { %v603_v37 = vpop.eup %602 }
  0x7f   : > { %v605_v38 = vpop.eup %604  ;;  %v303_v41 = vmul.f32 %v603_v37, %v245_v49  ;;  %v305_v43 = vmul.f32 %v603_v37, %v247_v50  ;;  %v307_v47 = vmul.f32 %v603_v37, %v249_v53  ;;  %v309_v54 = vmul.f32 %v603_v37, %v251_v59 }
  0x80   : > { %v304_v42 = vmul.f32 %v605_v38, %v246_v51  ;;  %v306_v44 = vmul.f32 %v605_v38, %v248_v52  ;;  %v308_v48 = vmul.f32 %v605_v38, %v250_v56  ;;  %v310_v55 = vmul.f32 %v605_v38, %v252_v62 }
  0x81   : > { %v313_v50 = vmul.f32 %v603_v37, %v255_v7  ;;  %v314_v51 = vmul.f32 %v605_v38, %v256_v10  ;;  %v311_v52 = vmul.f32 %v603_v37, %v919_v1  ;;  %v312_v53 = vmul.f32 %v605_v38, %v254_v4 }
  0xbb   : > { %v328_v35 = vpop.permute.xlu1 %327  ;;  %v318_v36 = vpop.permute.xlu0 %317 }
  0xbc   : > { %v345_v57 = vmul.f32 %v318_v36, %v303_v41  ;;  %v346_v58 = vmul.f32 %v318_v36, %v304_v42  ;;  %v349_v56 = vmul.f32 %v328_v35, %v307_v47  ;;  %v350_v59 = vmul.f32 %v328_v35, %v308_v48 }
  0xbf   : > { %v333_v39 = vpop.permute.xlu1 %332  ;;  %v323_v40 = vpop.permute.xlu0 %322 }
  0xc0   : > { %v347_v60 = vmul.f32 %v323_v40, %v305_v43  ;;  %v348_v61 = vmul.f32 %v323_v40, %v306_v44  ;;  %v351_v62 = vmul.f32 %v333_v39, %v309_v54  ;;  %v352_v6 = vmul.f32 %v333_v39, %v310_v55 }
  0xc3   : > { %v343_v45 = vpop.permute.xlu1 %342  ;;  %v338_v46 = vpop.permute.xlu0 %337 }
  0xc4   : > { %v355_v11 = vmul.f32 %v343_v45, %v313_v50  ;;  %v356_v12 = vmul.f32 %v343_v45, %v314_v51  ;;  %v353_v13 = vmul.f32 %v338_v46, %v311_v52  ;;  %v354_v14 = vmul.f32 %v338_v46, %v312_v53 }
  0xc7   : > { %v371_v63 = vpop.permute.xlu1 %370  ;;  %v366_v0 = vpop.permute.xlu0 %365 }
  0xc8   : > { %v395_v2 = vadd.f32 %v371_v63, %v347_v60  ;;  %v396_v3 = vadd.f32 %v371_v63, %v348_v61  ;;  %v393_v5 = vadd.f32 %v366_v0, %v345_v57  ;;  %v394_v49 = vadd.f32 %v366_v0, %v346_v58 }
  0xca   : > { %407 = vst [vmem:[%s926_s21 + $0x10] sm:$0xff] %v395_v2  ;;  %408 = vst [vmem:[%s926_s21 + $0x18] sm:$0xff] %v396_v3 }
  0xcb   : > { %405 = vst [vmem:[%s926_s21] sm:$0xff] %v393_v5  ;;  %406 = vst [vmem:[%s926_s21 + $0x8] sm:$0xff] %v394_v49  ;;  %v381_v1 = vpop.permute.xlu1 %380  ;;  %v376_v4 = vpop.permute.xlu0 %375 }
  0xcc   : > { %v399_v7 = vadd.f32 %v381_v1, %v351_v62  ;;  %v400_v8 = vadd.f32 %v381_v1, %v352_v6  ;;  %v397_v9 = vadd.f32 %v376_v4, %v349_v56  ;;  %v398_v10 = vadd.f32 %v376_v4, %v350_v59 }
  0xce   : > { %411 = vst [vmem:[%s926_s21 + $0x30] sm:$0xff] %v399_v7  ;;  %412 = vst [vmem:[%s926_s21 + $0x38] sm:$0xff] %v400_v8 }
  0xcf   : > { %409 = vst [vmem:[%s926_s21 + $0x20] sm:$0xff] %v397_v9  ;;  %410 = vst [vmem:[%s926_s21 + $0x28] sm:$0xff] %v398_v10  ;;  %v391_v15 = vpop.permute.xlu1 %390  ;;  %v386_v16 = vpop.permute.xlu0 %385 }
  0xd0   : > { %v403_v17 = vadd.f32 %v391_v15, %v355_v11  ;;  %v404_v18 = vadd.f32 %v391_v15, %v356_v12  ;;  %v401_v19 = vadd.f32 %v386_v16, %v353_v13  ;;  %v402_v20 = vadd.f32 %v386_v16, %v354_v14 }
  0xd2   : > { %415 = vst [vmem:[%s926_s21 + $0x50] sm:$0xff] %v403_v17  ;;  %416 = vst [vmem:[%s926_s21 + $0x58] sm:$0xff] %v404_v18 }
  0xd3   : > { %413 = vst [vmem:[%s926_s21 + $0x40] sm:$0xff] %v401_v19  ;;  %414 = vst [vmem:[%s926_s21 + $0x48] sm:$0xff] %v402_v20 }
  0xd4   : > { %649 = shalt.err (!%p646_p4)
}
  0xd5   : > { %s650_s22 = scalar_lea.hbm %s941_s8, 1536  ;;  %s654_s28 = scalar_lea.hbm %s999_s3, 3072 }
  0xd6   : > { %p651_p6 = scmp.ne.s32.totalorder %s941_s8, %s650_s22  ;;  %p655_p12 = scmp.lt.u32.totalorder %s941_s8, %s999_s3 }
  0xd7   : > { %p656_p1 = scmp.lt.u32.totalorder %s654_s28, %s650_s22  ;;  %p658_p8 = scmp.lt.u32.totalorder %s650_s22, %s941_s8 }
  0xd8   : > { %p652_p7 = pnand %p651_p6, %p1007_p9 }
  0xd9   : > { %p657_p3 = por %p656_p1, %p655_p12 }
  0xda   : > { %p653_p10 = pneg %p652_p7 }
  0xdb   : > { %p659_p11 = por %p658_p8, %p657_p3 }
  0xdd   : > { %p660_p0 = pnand %p659_p11, %p653_p10 }
  0xdf   : > { %663 = shalt.err (!%p660_p0)
}
  0xe0   : > { %s725_s21 = smov 256   ;;  %s726_s5 = smov 16  }
  0xe1   : > { %535 = dma.vmem_to_hbm [thread:$0]  (%p1007_p9), %s943_s18, 1536, %s941_s8, %s418_s19, %s725_s21, %s725_s21, %s726_s5  }
  0xe2 PF: > { %s448_s15 = sand.u32 1, %s698_s12   ;;  %p1008_p5 = scmp.ne.s32.totalorder %s1004_s27, 0 }
  0xe3   : > { %p1009_p13 = scmp.ge.s32.totalorder %s718_s17, 2  ;;  %s449_s6 = scalar_lea.sflag [#allocation4], %s448_s15 }
  0xe5   : > { %p542_p2 = pnand %p1009_p13, %p1008_p5 }
  0xe7   : > { %693 = dma.done.wait (!%p542_p2), %s449_s6, 1536  }
  0xe8   : > { %695 = vsyncadd (!%p542_p2), %s449_s6, 4294965760  ;;  %s19_s17 = sadd.s32 1, %s718_s17   ;;  %s1010_s12 = smov %s702_s13 }
  0xe9   : > { %p16_p4 = scmp.ge.s32.totalorder %s19_s17, 4   ;;  %s1011_s13 = smov %s706_s14 }
  0xea   : > { %s1012_s14 = smov %s803_s26  ;;  %s1013_s15 = smov %s714_s16 }
  0xeb   : > { %s1014_s16 = smov %s1016_s20  ;;  %18 = sbr.rel (!%p16_p4) target bundleno = 6 (0x6), region = 77 }
  0xf2   :  { %454 = vsyncpa [#allocation3], 1 }
  0xf3   :  { %456 = vsyncpa [#allocation3 + $0x1], 1 }
  0xf4   :  { %457 = vsyncpa [#allocation4], 1 }
  0xf5   :  { %459 = vsyncpa [#allocation4 + $0x1], 1 }

</bundles_post_ra>
